<compile_context>
chip_gen: v6e
topology: v6e:2x2x1
jax: 0.10.0
libtpu: 0.0.40
codegen_flags: <defaults>
</compile_context>

<pallas_src>
import jax
import jax.numpy as jnp
from jax.experimental import pallas as pl
from jax.experimental.pallas import tpu as pltpu

OBS_DIM = 16
ACT_DIM = 8
HIDDEN = 256
BATCH = 8


def _round_up(x, m):
    return ((x + m - 1) // m) * m


def _silu(x):
    # x * sigmoid(x) = x / (1 + exp(-x)); exp goes to the EUP slot.
    return x / (1.0 + jnp.exp(-x))


def ode_func_kernel(x_ref, a_ref,
                    w1x_ref, w1a_ref, b1_ref,
                    w2_ref, b2_ref,
                    w3_ref, b3_ref,
                    w4_ref, b4_ref,
                    out_ref):
    x = x_ref[...].astype(jnp.float32)
    a = a_ref[...].astype(jnp.float32)

    # Layer 1: split matmul is exactly Linear applied to concat([x, a], -1).
    z1 = (jnp.dot(x, w1x_ref[...], preferred_element_type=jnp.float32)
          + jnp.dot(a, w1a_ref[...], preferred_element_type=jnp.float32)
          + b1_ref[...])
    h1 = _silu(z1)
    h2 = _silu(jnp.dot(h1, w2_ref[...], preferred_element_type=jnp.float32)
               + b2_ref[...])
    h3 = _silu(jnp.dot(h2, w3_ref[...], preferred_element_type=jnp.float32)
               + b3_ref[...])
    out = jnp.dot(h3, w4_ref[...], preferred_element_type=jnp.float32) + b4_ref[...]
    out_ref[...] = out.astype(out_ref.dtype)


def ode_func_forward(t, x, a, params):
    """ODEFunc.forward(t, x_norm, a): x (B, obs_dim), a (B, act_dim) -> (B, obs_dim)."""
    del t  # ODEFunc.forward ignores t
    (w1x, w1a, b1, w2, b2, w3, b3, w4, b4) = params
    B, obs_dim = x.shape
    act_dim = a.shape[1]
    hid = w1x.shape[1]

    tb = min(128, _round_up(B, 8))          # sublane-aligned batch tile
    grid = (pl.cdiv(B, tb),)

    batch_map = lambda i: (i, 0)
    fixed_map = lambda i: (0, 0)            # weights: same block every grid step

    in_specs = [
        pl.BlockSpec((tb, obs_dim), batch_map),     # x
        pl.BlockSpec((tb, act_dim), batch_map),     # a
        pl.BlockSpec((obs_dim, hid), fixed_map),    # w1x
        pl.BlockSpec((act_dim, hid), fixed_map),    # w1a
        pl.BlockSpec((1, hid), fixed_map),          # b1
        pl.BlockSpec((hid, hid), fixed_map),        # w2
        pl.BlockSpec((1, hid), fixed_map),          # b2
        pl.BlockSpec((hid, hid), fixed_map),        # w3
        pl.BlockSpec((1, hid), fixed_map),          # b3
        pl.BlockSpec((hid, obs_dim), fixed_map),    # w4
        pl.BlockSpec((1, obs_dim), fixed_map),      # b4
    ]
    out_spec = pl.BlockSpec((tb, obs_dim), batch_map)

    return pl.pallas_call(
        ode_func_kernel,
        out_shape=jax.ShapeDtypeStruct((B, obs_dim), jnp.float32),
        grid=grid,
        in_specs=in_specs,
        out_specs=out_spec,
        compiler_params=pltpu.CompilerParams(
            dimension_semantics=("parallel",)),     # batch tiles are independent
    )(x, a, w1x, w1a, b1, w2, b2, w3, b3, w4, b4)


def _orthogonal(key, out_dim, in_dim, gain):
    """PyTorch layer_init analogue (orthogonal_ with gain); returns (in_dim, out_dim)."""
    rows, cols = out_dim, in_dim
    a = jax.random.normal(key, (max(rows, cols), min(rows, cols)), dtype=jnp.float32)
    q, r = jnp.linalg.qr(a)
    q = q * jnp.sign(jnp.diag(r))[None, :]
    if rows < cols:
        q = q.T
    else:
        q = q[:rows, :cols]
    w = gain * q                       # PyTorch layout (out, in)
    return w.T.astype(jnp.float32)     # kernel layout (in, out)


def init_params(key):
    gain = jnp.sqrt(2.0)
    ks = jax.random.split(key, 4)
    # First linear: (obs+act) -> hidden, split into obs-part / act-part.
    w1 = _orthogonal(ks[0], HIDDEN, OBS_DIM + ACT_DIM, gain)   # (obs+act, hidden)
    w1x = w1[:OBS_DIM, :]
    w1a = w1[OBS_DIM:, :]
    b1 = jnp.zeros((1, HIDDEN), jnp.float32)
    w2 = _orthogonal(ks[1], HIDDEN, HIDDEN, gain)
    b2 = jnp.zeros((1, HIDDEN), jnp.float32)
    w3 = _orthogonal(ks[2], HIDDEN, HIDDEN, gain)
    b3 = jnp.zeros((1, HIDDEN), jnp.float32)
    w4 = _orthogonal(ks[3], OBS_DIM, HIDDEN, gain)
    b4 = jnp.zeros((1, OBS_DIM), jnp.float32)
    return (w1x, w1a, b1, w2, b2, w3, b3, w4, b4)


def reference_forward(x, a, params):
    """Pure-JAX f32 reference of ODEFunc.forward (for sanity check)."""
    (w1x, w1a, b1, w2, b2, w3, b3, w4, b4) = params
    xa = jnp.concatenate([x.astype(jnp.float32), a.astype(jnp.float32)], axis=-1)
    w1 = jnp.concatenate([w1x, w1a], axis=0)
    h1 = jax.nn.silu(xa @ w1 + b1)
    h2 = jax.nn.silu(h1 @ w2 + b2)
    h3 = jax.nn.silu(h2 @ w3 + b3)
    return h3 @ w4 + b4


if __name__ == "__main__":
    key = jax.random.PRNGKey(0)
    kp, kx, ka = jax.random.split(key, 3)

    params = init_params(kp)
    x = jax.random.normal(kx, (BATCH, OBS_DIM), dtype=jnp.float32)
    a = jax.random.normal(ka, (BATCH, ACT_DIM), dtype=jnp.float32)
    t = jnp.zeros((), jnp.float32)   # ignored by ODEFunc.forward

    out = ode_func_forward(t, x, a, params)
    out = jax.block_until_ready(out)

    ref = reference_forward(x, a, params)
    assert out.shape == (BATCH, OBS_DIM)
    # f32 everywhere; small slack for MXU vs XLA matmul rounding differences.
    assert jnp.allclose(out, ref, atol=1e-2, rtol=1e-2)

    print("KERNEL_OK")
</pallas_src>

<mosaic_0001>
module attributes {stable_mosaic.version = 11 : i64} {
  func.func @ode_func_kernel(%arg0: i32, %arg1: memref<8x16xf32, #tpu.memory_space<vmem>>, %arg2: memref<8x8xf32, #tpu.memory_space<vmem>>, %arg3: memref<16x256xf32, #tpu.memory_space<vmem>>, %arg4: memref<8x256xf32, #tpu.memory_space<vmem>>, %arg5: memref<1x256xf32, #tpu.memory_space<vmem>>, %arg6: memref<256x256xf32, #tpu.memory_space<vmem>>, %arg7: memref<1x256xf32, #tpu.memory_space<vmem>>, %arg8: memref<256x256xf32, #tpu.memory_space<vmem>>, %arg9: memref<1x256xf32, #tpu.memory_space<vmem>>, %arg10: memref<256x16xf32, #tpu.memory_space<vmem>>, %arg11: memref<1x16xf32, #tpu.memory_space<vmem>>, %arg12: memref<8x16xf32, #tpu.memory_space<vmem>>) attributes {dimension_semantics = [#tpu.dimension_semantics<parallel>], iteration_bounds = array<i64: 1>, scalar_prefetch = 0 : i64, scratch_operands = 0 : i64, tpu.core_type = #tpu.core_type<tc>, window_params = [{transform_indices = @transform_0, window_bounds = array<i64: 8, 16>}, {transform_indices = @transform_1, window_bounds = array<i64: 8, 8>}, {pipeline_mode = #tpu.pipeline_mode<synchronous>, transform_indices = @transform_2, window_bounds = array<i64: 16, 256>}, {pipeline_mode = #tpu.pipeline_mode<synchronous>, transform_indices = @transform_3, window_bounds = array<i64: 8, 256>}, {pipeline_mode = #tpu.pipeline_mode<synchronous>, transform_indices = @transform_4, window_bounds = array<i64: 1, 256>}, {pipeline_mode = #tpu.pipeline_mode<synchronous>, transform_indices = @transform_5, window_bounds = array<i64: 256, 256>}, {pipeline_mode = #tpu.pipeline_mode<synchronous>, transform_indices = @transform_6, window_bounds = array<i64: 1, 256>}, {pipeline_mode = #tpu.pipeline_mode<synchronous>, transform_indices = @transform_7, window_bounds = array<i64: 256, 256>}, {pipeline_mode = #tpu.pipeline_mode<synchronous>, transform_indices = @transform_8, window_bounds = array<i64: 1, 256>}, {pipeline_mode = #tpu.pipeline_mode<synchronous>, transform_indices = @transform_9, window_bounds = array<i64: 256, 16>}, {pipeline_mode = #tpu.pipeline_mode<synchronous>, transform_indices = @transform_10, window_bounds = array<i64: 1, 16>}, {transform_indices = @transform_11, window_bounds = array<i64: 8, 16>}]} {
    %c0 = arith.constant 0 : index
    %c0_0 = arith.constant 0 : index
    %0 = vector.load %arg1[%c0, %c0_0] : memref<8x16xf32, #tpu.memory_space<vmem>>, vector<8x16xf32>
    %c0_1 = arith.constant 0 : index
    %c0_2 = arith.constant 0 : index
    %1 = vector.load %arg2[%c0_1, %c0_2] : memref<8x8xf32, #tpu.memory_space<vmem>>, vector<8x8xf32>
    %c0_3 = arith.constant 0 : index
    %c0_4 = arith.constant 0 : index
    %2 = vector.load %arg3[%c0_3, %c0_4] : memref<16x256xf32, #tpu.memory_space<vmem>>, vector<16x256xf32>
    %cst = arith.constant dense<0.000000e+00> : vector<8x256xf32>
    %3 = tpu.matmul %0, %2, %cst {dimension_numbers = #tpu.dot_dimension_numbers<[1], [0], [0], [1], [0, 0, 1, 1], [], []>} : vector<8x16xf32>, vector<16x256xf32>, vector<8x256xf32> -> vector<8x256xf32>
    %c0_5 = arith.constant 0 : index
    %c0_6 = arith.constant 0 : index
    %4 = vector.load %arg4[%c0_5, %c0_6] : memref<8x256xf32, #tpu.memory_space<vmem>>, vector<8x256xf32>
    %cst_7 = arith.constant dense<0.000000e+00> : vector<8x256xf32>
    %5 = tpu.matmul %1, %4, %cst_7 {dimension_numbers = #tpu.dot_dimension_numbers<[1], [0], [0], [1], [0, 0, 1, 1], [], []>} : vector<8x8xf32>, vector<8x256xf32>, vector<8x256xf32> -> vector<8x256xf32>
    %6 = arith.addf %3, %5 : vector<8x256xf32>
    %c0_8 = arith.constant 0 : index
    %c0_9 = arith.constant 0 : index
    %7 = vector.load %arg5[%c0_8, %c0_9] : memref<1x256xf32, #tpu.memory_space<vmem>>, vector<1x256xf32>
    %8 = vector.broadcast %7 : vector<1x256xf32> to vector<8x256xf32>
    %9 = arith.addf %6, %8 : vector<8x256xf32>
    %cst_10 = arith.constant 0.000000e+00 : f32
    %10 = vector.broadcast %cst_10 : f32 to vector<8x256xf32>
    %11 = arith.subf %10, %9 : vector<8x256xf32>
    %12 = math.exp %11 : vector<8x256xf32>
    %cst_11 = arith.constant 1.000000e+00 : f32
    %13 = vector.broadcast %cst_11 : f32 to vector<8x256xf32>
    %14 = arith.addf %13, %12 : vector<8x256xf32>
    %15 = arith.divf %9, %14 : vector<8x256xf32>
    %c0_12 = arith.constant 0 : index
    %c0_13 = arith.constant 0 : index
    %16 = vector.load %arg6[%c0_12, %c0_13] : memref<256x256xf32, #tpu.memory_space<vmem>>, vector<256x256xf32>
    %cst_14 = arith.constant dense<0.000000e+00> : vector<8x256xf32>
    %17 = tpu.matmul %15, %16, %cst_14 {dimension_numbers = #tpu.dot_dimension_numbers<[1], [0], [0], [1], [0, 0, 1, 1], [], []>} : vector<8x256xf32>, vector<256x256xf32>, vector<8x256xf32> -> vector<8x256xf32>
    %c0_15 = arith.constant 0 : index
    %c0_16 = arith.constant 0 : index
    %18 = vector.load %arg7[%c0_15, %c0_16] : memref<1x256xf32, #tpu.memory_space<vmem>>, vector<1x256xf32>
    %19 = vector.broadcast %18 : vector<1x256xf32> to vector<8x256xf32>
    %20 = arith.addf %17, %19 : vector<8x256xf32>
    %cst_17 = arith.constant 0.000000e+00 : f32
    %21 = vector.broadcast %cst_17 : f32 to vector<8x256xf32>
    %22 = arith.subf %21, %20 : vector<8x256xf32>
    %23 = math.exp %22 : vector<8x256xf32>
    %cst_18 = arith.constant 1.000000e+00 : f32
    %24 = vector.broadcast %cst_18 : f32 to vector<8x256xf32>
    %25 = arith.addf %24, %23 : vector<8x256xf32>
    %26 = arith.divf %20, %25 : vector<8x256xf32>
    %c0_19 = arith.constant 0 : index
    %c0_20 = arith.constant 0 : index
    %27 = vector.load %arg8[%c0_19, %c0_20] : memref<256x256xf32, #tpu.memory_space<vmem>>, vector<256x256xf32>
    %cst_21 = arith.constant dense<0.000000e+00> : vector<8x256xf32>
    %28 = tpu.matmul %26, %27, %cst_21 {dimension_numbers = #tpu.dot_dimension_numbers<[1], [0], [0], [1], [0, 0, 1, 1], [], []>} : vector<8x256xf32>, vector<256x256xf32>, vector<8x256xf32> -> vector<8x256xf32>
    %c0_22 = arith.constant 0 : index
    %c0_23 = arith.constant 0 : index
    %29 = vector.load %arg9[%c0_22, %c0_23] : memref<1x256xf32, #tpu.memory_space<vmem>>, vector<1x256xf32>
    %30 = vector.broadcast %29 : vector<1x256xf32> to vector<8x256xf32>
    %31 = arith.addf %28, %30 : vector<8x256xf32>
    %cst_24 = arith.constant 0.000000e+00 : f32
    %32 = vector.broadcast %cst_24 : f32 to vector<8x256xf32>
    %33 = arith.subf %32, %31 : vector<8x256xf32>
    %34 = math.exp %33 : vector<8x256xf32>
    %cst_25 = arith.constant 1.000000e+00 : f32
    %35 = vector.broadcast %cst_25 : f32 to vector<8x256xf32>
    %36 = arith.addf %35, %34 : vector<8x256xf32>
    %37 = arith.divf %31, %36 : vector<8x256xf32>
    %c0_26 = arith.constant 0 : index
    %c0_27 = arith.constant 0 : index
    %38 = vector.load %arg10[%c0_26, %c0_27] : memref<256x16xf32, #tpu.memory_space<vmem>>, vector<256x16xf32>
    %cst_28 = arith.constant dense<0.000000e+00> : vector<8x16xf32>
    %39 = tpu.matmul %37, %38, %cst_28 {dimension_numbers = #tpu.dot_dimension_numbers<[1], [0], [0], [1], [0, 0, 1, 1], [], []>} : vector<8x256xf32>, vector<256x16xf32>, vector<8x16xf32> -> vector<8x16xf32>
    %c0_29 = arith.constant 0 : index
    %c0_30 = arith.constant 0 : index
    %40 = vector.load %arg11[%c0_29, %c0_30] : memref<1x16xf32, #tpu.memory_space<vmem>>, vector<1x16xf32>
    %41 = vector.broadcast %40 : vector<1x16xf32> to vector<8x16xf32>
    %42 = arith.addf %39, %41 : vector<8x16xf32>
    %c0_31 = arith.constant 0 : index
    %c0_32 = arith.constant 0 : index
    %43 = vector.load %arg12[%c0_31, %c0_32] : memref<8x16xf32, #tpu.memory_space<vmem>>, vector<8x16xf32>
    tpu.vector_store %arg12[%c0_31, %c0_32], %42 {strides = array<i32>} : memref<8x16xf32, #tpu.memory_space<vmem>>, vector<8x16xf32>,
    return
  }
  func.func @transform_0(%arg0: i32) -> (i32, i32) {
    %c0_i32 = arith.constant 0 : i32
    %c0_i32_0 = arith.constant 0 : i32
    return %arg0, %c0_i32 : i32, i32
  }
  func.func @transform_1(%arg0: i32) -> (i32, i32) {
    %c0_i32 = arith.constant 0 : i32
    %c0_i32_0 = arith.constant 0 : i32
    return %arg0, %c0_i32 : i32, i32
  }
  func.func @transform_2(%arg0: i32) -> (i32, i32) {
    %c0_i32 = arith.constant 0 : i32
    %c0_i32_0 = arith.constant 0 : i32
    %c0_i32_1 = arith.constant 0 : i32
    return %c0_i32, %c0_i32_0 : i32, i32
  }
  func.func @transform_3(%arg0: i32) -> (i32, i32) {
    %c0_i32 = arith.constant 0 : i32
    %c0_i32_0 = arith.constant 0 : i32
    %c0_i32_1 = arith.constant 0 : i32
    return %c0_i32, %c0_i32_0 : i32, i32
  }
  func.func @transform_4(%arg0: i32) -> (i32, i32) {
    %c0_i32 = arith.constant 0 : i32
    %c0_i32_0 = arith.constant 0 : i32
    %c0_i32_1 = arith.constant 0 : i32
    return %c0_i32, %c0_i32_0 : i32, i32
  }
  func.func @transform_5(%arg0: i32) -> (i32, i32) {
    %c0_i32 = arith.constant 0 : i32
    %c0_i32_0 = arith.constant 0 : i32
    %c0_i32_1 = arith.constant 0 : i32
    return %c0_i32, %c0_i32_0 : i32, i32
  }
  func.func @transform_6(%arg0: i32) -> (i32, i32) {
    %c0_i32 = arith.constant 0 : i32
    %c0_i32_0 = arith.constant 0 : i32
    %c0_i32_1 = arith.constant 0 : i32
    return %c0_i32, %c0_i32_0 : i32, i32
  }
  func.func @transform_7(%arg0: i32) -> (i32, i32) {
    %c0_i32 = arith.constant 0 : i32
    %c0_i32_0 = arith.constant 0 : i32
    %c0_i32_1 = arith.constant 0 : i32
    return %c0_i32, %c0_i32_0 : i32, i32
  }
  func.func @transform_8(%arg0: i32) -> (i32, i32) {
    %c0_i32 = arith.constant 0 : i32
    %c0_i32_0 = arith.constant 0 : i32
    %c0_i32_1 = arith.constant 0 : i32
    return %c0_i32, %c0_i32_0 : i32, i32
  }
  func.func @transform_9(%arg0: i32) -> (i32, i32) {
    %c0_i32 = arith.constant 0 : i32
    %c0_i32_0 = arith.constant 0 : i32
    %c0_i32_1 = arith.constant 0 : i32
    return %c0_i32, %c0_i32_0 : i32, i32
  }
  func.func @transform_10(%arg0: i32) -> (i32, i32) {
    %c0_i32 = arith.constant 0 : i32
    %c0_i32_0 = arith.constant 0 : i32
    %c0_i32_1 = arith.constant 0 : i32
    return %c0_i32, %c0_i32_0 : i32, i32
  }
  func.func @transform_11(%arg0: i32) -> (i32, i32) {
    %c0_i32 = arith.constant 0 : i32
    %c0_i32_0 = arith.constant 0 : i32
    return %arg0, %c0_i32 : i32, i32
  }
}

</mosaic_0001>

<bundles_post_ra>
// kernel: tpu_custom_call.1
= control target key start
LH: loop header
LB: loop body
LE: loop exit
PB: predicated region body
PF: predicated region fallthrough
CT: control target
= control target key end

     0   :  { %16 = vsyncpa [#allocation3], 0  ;;  %s1048_s0 = inlined_call_operand.vmem [shape: f32[8,16], index: 0, kind: input, shape index: {}]   ;;  %s1049_s1 = inlined_call_operand.vmem [shape: f32[8,8], index: 1, kind: input, shape index: {}]   ;;  %s1050_s2 = inlined_call_operand.vmem [shape: f32[16,256], index: 2, kind: input, shape index: {}]   ;;  %s1051_s3 = inlined_call_operand.vmem [shape: f32[8,256], index: 3, kind: input, shape index: {}]   ;;  %s1052_s4 = inlined_call_operand.vmem [shape: f32[1,256], index: 4, kind: input, shape index: {}]   ;;  %s1053_s5 = inlined_call_operand.hbm [shape: f32[256,256], index: 5, kind: input, shape index: {}]   ;;  %s1054_s6 = inlined_call_operand.vmem [shape: f32[1,256], index: 6, kind: input, shape index: {}]   ;;  %s1055_s7 = inlined_call_operand.hbm [shape: f32[256,256], index: 7, kind: input, shape index: {}]   ;;  %s1056_s8 = inlined_call_operand.vmem [shape: f32[1,256], index: 8, kind: input, shape index: {}]   ;;  %s1057_s9 = inlined_call_operand.vmem [shape: f32[256,16], index: 9, kind: input, shape index: {}]   ;;  %s1058_s10 = inlined_call_operand.vmem [shape: f32[1,16], index: 10, kind: input, shape index: {}]   ;;  %s1059_s11 = inlined_call_operand.hbm [shape: f32[8,16], index: 11, kind: output, shape index: {}]  }
   0x1   :  { %17 = vsyncpa [#allocation6], 0 }
   0x2   :  { %18 = vsyncpa [#allocation4], 0  ;;  %s829_s17 = smov [#allocation2]  }
   0x3   :  { %s34_s18 = sshll.u32 %s829_s17, 4  ;;  %s35_s18 = int_to_ptr.vmem [resolvable:$true] %s34_s18 }
   0x4   :  { %s771_s19 = scalar_lea.vmem %s35_s18, 8192  ;;  %p776_p1 = scmp.lt.s32.totalorder %s35_s18, %s35_s18 }
   0x5   :  { %p772_p0 = scmp.ne.s32.totalorder %s35_s18, %s771_s19  ;;  %p777_p2 = scmp.lt.s32.totalorder %s771_s19, %s771_s19 }
   0x7   :  { %p778_p3 = por %p777_p2, %p776_p1 }
   0x9   :  { %p779_p4 = pnand %p778_p3, %p772_p0 }
   0xb   :  { %782 = shalt.err (!%p779_p4)
}
   0xc   :  { %s830_s20 = smov 256   ;;  %s831_s21 = smov 16  }
   0xd   :  { %40 = dma.hbm_to_vmem [thread:$0]  %s1053_s5, 8192, %s35_s18, [#allocation3], %s830_s20, %s830_s20, %s831_s21  }
   0xe   :  { %s832_s24 = smov [#allocation5]  }
   0xf   :  { %s48_s25 = sshll.u32 %s832_s24, 4  ;;  %s49_s25 = int_to_ptr.vmem [resolvable:$true] %s48_s25 }
  0x10   :  { %s791_s26 = scalar_lea.vmem %s49_s25, 8192  ;;  %p796_p6 = scmp.lt.s32.totalorder %s49_s25, %s49_s25 }
  0x11   :  { %p792_p5 = scmp.ne.s32.totalorder %s49_s25, %s791_s26  ;;  %p797_p7 = scmp.lt.s32.totalorder %s791_s26, %s791_s26 }
  0x13   :  { %p798_p8 = por %p797_p7, %p796_p6 }
  0x15   :  { %p799_p9 = pnand %p798_p8, %p792_p5 }
  0x17   :  { %802 = shalt.err (!%p799_p9)
}
  0x18   :  { %54 = dma.hbm_to_vmem [thread:$0]  %s1055_s7, 8192, %s49_s25, [#allocation6], %s830_s20, %s830_s20, %s831_s21  }
  0x19   :  { %823 = dma.done.wait [#allocation3], 8192  }
  0x1a   :  { %824 = vsyncadd [#allocation3], 4294959104 }
  0x1b   :  { %825 = dma.done.wait [#allocation6], 8192  }
  0x1c   :  { %826 = vsyncadd [#allocation6], 4294959104  ;;  %v833_v0 = vmov 0.0   ;;  %v74_v1 = vld [vmem:[%s1051_s3 + $0x8] sm:$0xff]  ;;  %v73_v2 = vld [vmem:[%s1051_s3] sm:$0xff]  ;;  %vm75_vm0 = vcmask 64512  }
  0x1d   :  { %143 = vmatprep.mubr.f32.mxu1 %v833_v0  ;;  %v68_v3 = vld [vmem:[%s1049_s1] sm:$0xff]  ;;  %109 = vmatprep.subr.mxu1 %v74_v1  ;;  %v72_v4 = vld [vmem:[%s1050_s2 + $0x18] sm:$0xff]  ;;  %v71_v5 = vld [vmem:[%s1050_s2 + $0x10] sm:$0xff]  ;;  %vm150_vm1 = vcmask 130048   ;;  %s834_s14 = smov [#allocation7]  }
  0x1e   :  { %110 = vmatpush1.msra.mxu1 %v73_v2  ;;  %v70_v6 = vld [vmem:[%s1050_s2 + $0x8] sm:$0xff]  ;;  %v282_v7 = vld [vmem:[#allocation2 + $0xf8] sm:$0xff]  ;;  %v69_v8 = vld [vmem:[%s1050_s2] sm:$0xff]  ;;  %s685_s7 = sshll.u32 %s834_s14, 4  ;;  %s686_s7 = int_to_ptr.vmem [resolvable:$true] %s685_s7 }
  0x1f   :  { %695 = vmatmul.mubr.msk.f32.vlgmr.msra.gmra.mxu1 %vm75_vm0, %v68_v3  ;;  %182 = vmatprep.subr.mxu1 %v72_v4  ;;  %v281_v9 = vld [vmem:[#allocation2 + $0xf0] sm:$0xff]  ;;  %v67_v10 = vld [vmem:[%s1048_s0] sm:$0xff]  ;;  %v280_v11 = vld [vmem:[#allocation2 + $0xe8] sm:$0xff]  ;;  %s803_s15 = scalar_lea.vmem %s686_s7, 128  ;;  %p808_p11 = scmp.lt.s32.totalorder %s686_s7, %s686_s7 }
  0x20   :  { %183 = vmatpush1.msra.mxu1 %v71_v5  ;;  %218 = vmatprep.mubr.f32.mxu1 %v833_v0  ;;  %v279_v12 = vld [vmem:[#allocation2 + $0xe0] sm:$0xff]  ;;  %v278_v13 = vld [vmem:[#allocation2 + $0xd8] sm:$0xff]  ;;  %v277_v14 = vld [vmem:[#allocation2 + $0xd0] sm:$0xff]  ;;  %p804_p10 = scmp.ne.s32.totalorder %s686_s7, %s803_s15  ;;  %p809_p12 = scmp.lt.s32.totalorder %s803_s15, %s803_s15 }
  0x21   :  { %184 = vmatprep.subr.mxu1 %v70_v6  ;;  %327 = vmatprep.subr.mxu0 %v282_v7  ;;  %v276_v15 = vld [vmem:[#allocation2 + $0xc8] sm:$0xff]  ;;  %v275_v16 = vld [vmem:[#allocation2 + $0xc0] sm:$0xff]  ;;  %v274_v17 = vld [vmem:[#allocation2 + $0xb8] sm:$0xff] }
  0x22   :  { %185 = vmatpush1.msra.mxu1 %v69_v8  ;;  %328 = vmatpush1.msra.mxu0 %v281_v9  ;;  %v273_v18 = vld [vmem:[#allocation2 + $0xb0] sm:$0xff]  ;;  %v272_v19 = vld [vmem:[#allocation2 + $0xa8] sm:$0xff]  ;;  %v271_v20 = vld [vmem:[#allocation2 + $0xa0] sm:$0xff]  ;;  %p810_p13 = por %p809_p12, %p808_p11 }
  0x23   :  { %696 = vmatmul.mubr.msk.f32.vlgmr.msra.gmra.mxu1 %vm150_vm1, %v67_v10  ;;  %329 = vmatprep.subr.mxu0 %v280_v11  ;;  %v270_v21 = vld [vmem:[#allocation2 + $0x98] sm:$0xff]  ;;  %v269_v22 = vld [vmem:[#allocation2 + $0x90] sm:$0xff]  ;;  %v268_v23 = vld [vmem:[#allocation2 + $0x88] sm:$0xff] }
  0x24   :  { %330 = vmatpush1.msra.mxu0 %v279_v12  ;;  %v267_v24 = vld [vmem:[#allocation2 + $0x80] sm:$0xff]  ;;  %v266_v25 = vld [vmem:[#allocation2 + $0x78] sm:$0xff]  ;;  %v265_v26 = vld [vmem:[#allocation2 + $0x70] sm:$0xff]  ;;  %p811_p0 = pnand %p810_p13, %p804_p10 }
  0x25   :  { %331 = vmatprep.subr.mxu0 %v278_v13  ;;  %v264_v27 = vld [vmem:[#allocation2 + $0x68] sm:$0xff]  ;;  %v263_v28 = vld [vmem:[#allocation2 + $0x60] sm:$0xff]  ;;  %v262_v29 = vld [vmem:[#allocation2 + $0x58] sm:$0xff] }
  0x26   :  { %332 = vmatpush1.msra.mxu0 %v277_v14  ;;  %v261_v30 = vld [vmem:[#allocation2 + $0x50] sm:$0xff]  ;;  %v260_v31 = vld [vmem:[#allocation2 + $0x48] sm:$0xff]  ;;  %v259_v32 = vld [vmem:[#allocation2 + $0x40] sm:$0xff] }
  0x27   :  { %333 = vmatprep.subr.mxu0 %v276_v15  ;;  %v258_v33 = vld [vmem:[#allocation2 + $0x38] sm:$0xff]  ;;  %v257_v34 = vld [vmem:[#allocation2 + $0x30] sm:$0xff]  ;;  %v256_v35 = vld [vmem:[#allocation2 + $0x28] sm:$0xff] }
  0x28   :  { %334 = vmatpush1.msra.mxu0 %v275_v16  ;;  %v255_v36 = vld [vmem:[#allocation2 + $0x20] sm:$0xff]  ;;  %v254_v37 = vld [vmem:[#allocation2 + $0x18] sm:$0xff]  ;;  %v253_v38 = vld [vmem:[#allocation2 + $0x10] sm:$0xff] }
  0x29   :  { %335 = vmatprep.subr.mxu0 %v274_v17  ;;  %v252_v39 = vld [vmem:[#allocation2 + $0x8] sm:$0xff]  ;;  %v251_v40 = vld [vmem:[#allocation2] sm:$0xff]  ;;  %v314_v41 = vld [vmem:[#allocation2 + $0x1f8] sm:$0xff] }
  0x2a   :  { %336 = vmatpush1.msra.mxu0 %v273_v18  ;;  %v313_v42 = vld [vmem:[#allocation2 + $0x1f0] sm:$0xff]  ;;  %v312_v43 = vld [vmem:[#allocation2 + $0x1e8] sm:$0xff]  ;;  %v311_v44 = vld [vmem:[#allocation2 + $0x1e0] sm:$0xff] }
  0x2b   :  { %337 = vmatprep.subr.mxu0 %v272_v19  ;;  %v310_v45 = vld [vmem:[#allocation2 + $0x1d8] sm:$0xff]  ;;  %v309_v46 = vld [vmem:[#allocation2 + $0x1d0] sm:$0xff]  ;;  %v308_v47 = vld [vmem:[#allocation2 + $0x1c8] sm:$0xff] }
  0x2c   :  { %338 = vmatpush1.msra.mxu0 %v271_v20  ;;  %v307_v48 = vld [vmem:[#allocation2 + $0x1c0] sm:$0xff]  ;;  %v306_v49 = vld [vmem:[#allocation2 + $0x1b8] sm:$0xff]  ;;  %v305_v50 = vld [vmem:[#allocation2 + $0x1b0] sm:$0xff] }
  0x2d   :  { %339 = vmatprep.subr.mxu0 %v270_v21  ;;  %v304_v51 = vld [vmem:[#allocation2 + $0x1a8] sm:$0xff]  ;;  %v303_v52 = vld [vmem:[#allocation2 + $0x1a0] sm:$0xff]  ;;  %v302_v53 = vld [vmem:[#allocation2 + $0x198] sm:$0xff] }
  0x2e   :  { %340 = vmatpush1.msra.mxu0 %v269_v22  ;;  %v301_v54 = vld [vmem:[#allocation2 + $0x190] sm:$0xff]  ;;  %v300_v55 = vld [vmem:[#allocation2 + $0x188] sm:$0xff]  ;;  %v299_v56 = vld [vmem:[#allocation2 + $0x180] sm:$0xff] }
  0x2f   :  { %341 = vmatprep.subr.mxu0 %v268_v23  ;;  %v298_v57 = vld [vmem:[#allocation2 + $0x178] sm:$0xff]  ;;  %v297_v58 = vld [vmem:[#allocation2 + $0x170] sm:$0xff]  ;;  %v296_v59 = vld [vmem:[#allocation2 + $0x168] sm:$0xff] }
  0x30   :  { %342 = vmatpush1.msra.mxu0 %v267_v24  ;;  %v295_v60 = vld [vmem:[#allocation2 + $0x160] sm:$0xff]  ;;  %v294_v61 = vld [vmem:[#allocation2 + $0x158] sm:$0xff]  ;;  %v293_v62 = vld [vmem:[#allocation2 + $0x150] sm:$0xff] }
  0x31   :  { %343 = vmatprep.subr.mxu0 %v266_v25  ;;  %v292_v63 = vld [vmem:[#allocation2 + $0x148] sm:$0xff]  ;;  %v291_v0 = vld [vmem:[#allocation2 + $0x140] sm:$0xff]  ;;  %v290_v1 = vld [vmem:[#allocation2 + $0x138] sm:$0xff] }
  0x32   :  { %344 = vmatpush1.msra.mxu0 %v265_v26  ;;  %v289_v2 = vld [vmem:[#allocation2 + $0x130] sm:$0xff]  ;;  %v288_v3 = vld [vmem:[#allocation2 + $0x128] sm:$0xff]  ;;  %v287_v4 = vld [vmem:[#allocation2 + $0x120] sm:$0xff] }
  0x33   :  { %345 = vmatprep.subr.mxu0 %v264_v27  ;;  %v286_v5 = vld [vmem:[#allocation2 + $0x118] sm:$0xff]  ;;  %v285_v6 = vld [vmem:[#allocation2 + $0x110] sm:$0xff]  ;;  %v284_v7 = vld [vmem:[#allocation2 + $0x108] sm:$0xff] }
  0x34   :  { %346 = vmatpush1.msra.mxu0 %v263_v28  ;;  %v283_v8 = vld [vmem:[#allocation2 + $0x100] sm:$0xff]  ;;  %v441_v9 = vld [vmem:[#allocation5 + $0xf8] sm:$0xff]  ;;  %v440_v10 = vld [vmem:[#allocation5 + $0xf0] sm:$0xff] }
  0x35   :  { %347 = vmatprep.subr.mxu0 %v262_v29  ;;  %v439_v11 = vld [vmem:[#allocation5 + $0xe8] sm:$0xff]  ;;  %486 = vmatprep.subr.mxu1 %v441_v9  ;;  %v438_v12 = vld [vmem:[#allocation5 + $0xe0] sm:$0xff]  ;;  %v437_v13 = vld [vmem:[#allocation5 + $0xd8] sm:$0xff] }
  0x36   :  { %348 = vmatpush1.msra.mxu0 %v261_v30  ;;  %487 = vmatpush1.msra.mxu1 %v440_v10  ;;  %v436_v14 = vld [vmem:[#allocation5 + $0xd0] sm:$0xff]  ;;  %v435_v15 = vld [vmem:[#allocation5 + $0xc8] sm:$0xff]  ;;  %v434_v16 = vld [vmem:[#allocation5 + $0xc0] sm:$0xff] }
  0x37   :  { %349 = vmatprep.subr.mxu0 %v260_v31  ;;  %488 = vmatprep.subr.mxu1 %v439_v11  ;;  %v433_v17 = vld [vmem:[#allocation5 + $0xb8] sm:$0xff]  ;;  %v432_v18 = vld [vmem:[#allocation5 + $0xb0] sm:$0xff]  ;;  %v431_v19 = vld [vmem:[#allocation5 + $0xa8] sm:$0xff]  ;;  %v227_v31 = vlaneseq }
  0x38   :  { %350 = vmatpush1.msra.mxu0 %v259_v32  ;;  %489 = vmatpush1.msra.mxu1 %v438_v12  ;;  %v430_v20 = vld [vmem:[#allocation5 + $0xa0] sm:$0xff]  ;;  %v429_v21 = vld [vmem:[#allocation5 + $0x98] sm:$0xff]  ;;  %v428_v22 = vld [vmem:[#allocation5 + $0x90] sm:$0xff] }
  0x39   :  { %351 = vmatprep.subr.mxu0 %v258_v33  ;;  %490 = vmatprep.subr.mxu1 %v437_v13  ;;  %v427_v23 = vld [vmem:[#allocation5 + $0x88] sm:$0xff]  ;;  %v426_v24 = vld [vmem:[#allocation5 + $0x80] sm:$0xff]  ;;  %v425_v25 = vld [vmem:[#allocation5 + $0x78] sm:$0xff]  ;;  %v228_v32 = vshrl.u32 %v227_v31, 7 }
  0x3a   :  { %352 = vmatpush1.msra.mxu0 %v257_v34  ;;  %491 = vmatpush1.msra.mxu1 %v436_v14  ;;  %v424_v26 = vld [vmem:[#allocation5 + $0x70] sm:$0xff]  ;;  %v423_v27 = vld [vmem:[#allocation5 + $0x68] sm:$0xff]  ;;  %v422_v28 = vld [vmem:[#allocation5 + $0x60] sm:$0xff] }
  0x3b   :  { %353 = vmatprep.subr.mxu0 %v256_v35  ;;  %492 = vmatprep.subr.mxu1 %v435_v15  ;;  %v421_v29 = vld [vmem:[#allocation5 + $0x58] sm:$0xff]  ;;  %v420_v30 = vld [vmem:[#allocation5 + $0x50] sm:$0xff]  ;;  %v926_v33 = vsub.s32 0, %v228_v32  ;;  %v225_v35 = vld [vmem:[%s1052_s4] sm:$0x3] }
  0x3c   :  { %354 = vmatpush1.msra.mxu0 %v255_v36  ;;  %493 = vmatpush1.msra.mxu1 %v434_v16  ;;  %v931_v36 = vsub.s32 1, %v228_v32  ;;  %v468_v9 = vld [vmem:[#allocation5 + $0x1d0] sm:$0xff]  ;;  %v467_v10 = vld [vmem:[#allocation5 + $0x1c8] sm:$0xff]  ;;  %v466_v11 = vld [vmem:[#allocation5 + $0x1c0] sm:$0xff] }
  0x3d   :  { %355 = vmatprep.subr.mxu0 %v254_v37  ;;  %494 = vmatprep.subr.mxu1 %v433_v17  ;;  %v465_v12 = vld [vmem:[#allocation5 + $0x1b8] sm:$0xff]  ;;  %v464_v13 = vld [vmem:[#allocation5 + $0x1b0] sm:$0xff]  ;;  %v463_v14 = vld [vmem:[#allocation5 + $0x1a8] sm:$0xff] }
  0x3e   :  { %356 = vmatpush1.msra.mxu0 %v253_v38  ;;  %495 = vmatpush1.msra.mxu1 %v432_v18  ;;  %v230_v38 = vrot.slane %v225_v35, %v926_v33  ;;  %v462_v15 = vld [vmem:[#allocation5 + $0x1a0] sm:$0xff]  ;;  %v461_v16 = vld [vmem:[#allocation5 + $0x198] sm:$0xff]  ;;  %v460_v17 = vld [vmem:[#allocation5 + $0x190] sm:$0xff] }
  0x3f   :  { %357 = vmatprep.subr.mxu0 %v252_v39  ;;  %496 = vmatprep.subr.mxu1 %v431_v19  ;;  %v459_v18 = vld [vmem:[#allocation5 + $0x188] sm:$0xff]  ;;  %v458_v19 = vld [vmem:[#allocation5 + $0x180] sm:$0xff]  ;;  %v445_v32 = vld [vmem:[#allocation5 + $0x118] sm:$0xff] }
  0x40   :  { %358 = vmatpush1.msra.mxu0 %v251_v40  ;;  %497 = vmatpush1.msra.mxu1 %v430_v20  ;;  %v457_v20 = vld [vmem:[#allocation5 + $0x178] sm:$0xff]  ;;  %v446_v31 = vld [vmem:[#allocation5 + $0x120] sm:$0xff] }
  0x41   :  { %359 = vmatprep.subr.mxu0 %v314_v41  ;;  %498 = vmatprep.subr.mxu1 %v429_v21  ;;  %v234_v41 = vrot.slane %v225_v35, %v931_v36  ;;  %v456_v21 = vld [vmem:[#allocation5 + $0x170] sm:$0xff]  ;;  %v443_v35 = vld [vmem:[#allocation5 + $0x108] sm:$0xff] }
  0x42   :  { %360 = vmatpush2.msra.mxu0 %v313_v42  ;;  %499 = vmatpush1.msra.mxu1 %v428_v22  ;;  %v455_v22 = vld [vmem:[#allocation5 + $0x168] sm:$0xff] }
  0x43   :  { %361 = vmatprep.subr.mxu0 %v312_v43  ;;  %500 = vmatprep.subr.mxu1 %v427_v23  ;;  %v454_v23 = vld [vmem:[#allocation5 + $0x160] sm:$0xff] }
  0x44   :  { %362 = vmatpush2.msra.mxu0 %v311_v44  ;;  %501 = vmatpush1.msra.mxu1 %v426_v24  ;;  %v453_v24 = vld [vmem:[#allocation5 + $0x158] sm:$0xff] }
  0x45   :  { %363 = vmatprep.subr.mxu0 %v310_v45  ;;  %502 = vmatprep.subr.mxu1 %v425_v25  ;;  %v452_v25 = vld [vmem:[#allocation5 + $0x150] sm:$0xff] }
  0x46   :  { %364 = vmatpush2.msra.mxu0 %v309_v46  ;;  %503 = vmatpush1.msra.mxu1 %v424_v26  ;;  %v451_v26 = vld [vmem:[#allocation5 + $0x148] sm:$0xff] }
  0x47   :  { %365 = vmatprep.subr.mxu0 %v308_v47  ;;  %504 = vmatprep.subr.mxu1 %v423_v27  ;;  %v450_v27 = vld [vmem:[#allocation5 + $0x140] sm:$0xff] }
  0x48   :  { %366 = vmatpush2.msra.mxu0 %v307_v48  ;;  %505 = vmatpush1.msra.mxu1 %v422_v28  ;;  %v449_v28 = vld [vmem:[#allocation5 + $0x138] sm:$0xff] }
  0x49   :  { %367 = vmatprep.subr.mxu0 %v306_v49  ;;  %506 = vmatprep.subr.mxu1 %v421_v29  ;;  %v448_v29 = vld [vmem:[#allocation5 + $0x130] sm:$0xff] }
  0x4a   :  { %368 = vmatpush2.msra.mxu0 %v305_v50  ;;  %507 = vmatpush1.msra.mxu1 %v420_v30  ;;  %v447_v30 = vld [vmem:[#allocation5 + $0x128] sm:$0xff] }
  0x4b   :  { %369 = vmatprep.subr.mxu0 %v304_v51 }
  0x4c   :  { %370 = vmatpush2.msra.mxu0 %v303_v52 }
  0x4d   :  { %371 = vmatprep.subr.mxu0 %v302_v53 }
  0x4e   :  { %372 = vmatpush2.msra.mxu0 %v301_v54 }
  0x4f   :  { %373 = vmatprep.subr.mxu0 %v300_v55 }
  0x50   :  { %374 = vmatpush2.msra.mxu0 %v299_v56 }
  0x51   :  { %375 = vmatprep.subr.mxu0 %v298_v57 }
  0x52   :  { %376 = vmatpush2.msra.mxu0 %v297_v58  ;;  %v419_v58 = vld [vmem:[#allocation5 + $0x48] sm:$0xff] }
  0x53   :  { %377 = vmatprep.subr.mxu0 %v296_v59  ;;  %508 = vmatprep.subr.mxu1 %v419_v58  ;;  %v418_v59 = vld [vmem:[#allocation5 + $0x40] sm:$0xff]  ;;  %v584_v58 = vld [vmem:[%s1057_s9 + $0x78] sm:$0xff] }
  0x54   :  { %378 = vmatpush2.msra.mxu0 %v295_v60  ;;  %509 = vmatpush1.msra.mxu1 %v418_v59  ;;  %v417_v60 = vld [vmem:[#allocation5 + $0x38] sm:$0xff]  ;;  %v599_v59 = vld [vmem:[%s1057_s9 + $0xf0] sm:$0xff] }
  0x55   :  { %379 = vmatprep.subr.mxu0 %v294_v61  ;;  %510 = vmatprep.subr.mxu1 %v417_v60  ;;  %v416_v61 = vld [vmem:[#allocation5 + $0x30] sm:$0xff] }
  0x56   :  { %380 = vmatpush2.msra.mxu0 %v293_v62  ;;  %511 = vmatpush1.msra.mxu1 %v416_v61  ;;  %v415_v62 = vld [vmem:[#allocation5 + $0x28] sm:$0xff]  ;;  %v583_v60 = vld [vmem:[%s1057_s9 + $0x70] sm:$0xff] }
  0x57   :  { %381 = vmatprep.subr.mxu0 %v292_v63  ;;  %512 = vmatprep.subr.mxu1 %v415_v62  ;;  %v414_v63 = vld [vmem:[#allocation5 + $0x20] sm:$0xff]  ;;  %v598_v61 = vld [vmem:[%s1057_s9 + $0xe8] sm:$0xff] }
  0x58   :  { %382 = vmatpush2.msra.mxu0 %v291_v0  ;;  %513 = vmatpush1.msra.mxu1 %v414_v63  ;;  %v413_v0 = vld [vmem:[#allocation5 + $0x18] sm:$0xff]  ;;  %v582_v62 = vld [vmem:[%s1057_s9 + $0x68] sm:$0xff]  ;;  %v597_v63 = vld [vmem:[%s1057_s9 + $0xe0] sm:$0xff] }
  0x59   :  { %383 = vmatprep.subr.mxu0 %v290_v1  ;;  %514 = vmatprep.subr.mxu1 %v413_v0  ;;  %v412_v1 = vld [vmem:[#allocation5 + $0x10] sm:$0xff]  ;;  %v581_v0 = vld [vmem:[%s1057_s9 + $0x60] sm:$0xff] }
  0x5a   :  { %384 = vmatpush2.msra.mxu0 %v289_v2  ;;  %515 = vmatpush1.msra.mxu1 %v412_v1  ;;  %v411_v2 = vld [vmem:[#allocation5 + $0x8] sm:$0xff]  ;;  %v596_v1 = vld [vmem:[%s1057_s9 + $0xd8] sm:$0xff] }
  0x5b   :  { %385 = vmatprep.subr.mxu0 %v288_v3  ;;  %516 = vmatprep.subr.mxu1 %v411_v2  ;;  %v410_v3 = vld [vmem:[#allocation5] sm:$0xff]  ;;  %v580_v2 = vld [vmem:[%s1057_s9 + $0x58] sm:$0xff] }
  0x5c   :  { %386 = vmatpush2.msra.mxu0 %v287_v4  ;;  %517 = vmatpush1.msra.mxu1 %v410_v3  ;;  %v473_v4 = vld [vmem:[#allocation5 + $0x1f8] sm:$0xff]  ;;  %v595_v3 = vld [vmem:[%s1057_s9 + $0xd0] sm:$0xff] }
  0x5d   :  { %387 = vmatprep.subr.mxu0 %v286_v5  ;;  %518 = vmatprep.subr.mxu1 %v473_v4  ;;  %v472_v5 = vld [vmem:[#allocation5 + $0x1f0] sm:$0xff] }
  0x5e   :  { %388 = vmatpush2.msra.mxu0 %v285_v6  ;;  %519 = vmatpush2.msra.mxu1 %v472_v5  ;;  %v471_v6 = vld [vmem:[#allocation5 + $0x1e8] sm:$0xff]  ;;  %v579_v4 = vld [vmem:[%s1057_s9 + $0x50] sm:$0xff] }
  0x5f   :  { %389 = vmatprep.subr.mxu0 %v284_v7  ;;  %520 = vmatprep.subr.mxu1 %v471_v6  ;;  %v470_v7 = vld [vmem:[#allocation5 + $0x1e0] sm:$0xff]  ;;  %v594_v5 = vld [vmem:[%s1057_s9 + $0xc8] sm:$0xff] }
  0x60   :  { %390 = vmatpush2.msra.mxu0 %v283_v8  ;;  %521 = vmatpush2.msra.mxu1 %v470_v7  ;;  %v469_v8 = vld [vmem:[#allocation5 + $0x1d8] sm:$0xff]  ;;  %v578_v6 = vld [vmem:[%s1057_s9 + $0x48] sm:$0xff]  ;;  %v593_v7 = vld [vmem:[%s1057_s9 + $0xc0] sm:$0xff] }
  0x61   :  { %522 = vmatprep.subr.mxu1 %v469_v8  ;;  %v577_v8 = vld [vmem:[%s1057_s9 + $0x40] sm:$0xff] }
  0x62   :  { %523 = vmatpush2.msra.mxu1 %v468_v9  ;;  %v592_v9 = vld [vmem:[%s1057_s9 + $0xb8] sm:$0xff] }
  0x63   :  { %524 = vmatprep.subr.mxu1 %v467_v10  ;;  %v576_v10 = vld [vmem:[%s1057_s9 + $0x38] sm:$0xff] }
  0x64   :  { %525 = vmatpush2.msra.mxu1 %v466_v11  ;;  %v591_v11 = vld [vmem:[%s1057_s9 + $0xb0] sm:$0xff] }
  0x65   :  { %526 = vmatprep.subr.mxu1 %v465_v12  ;;  %v575_v12 = vld [vmem:[%s1057_s9 + $0x30] sm:$0xff] }
  0x66   :  { %527 = vmatpush2.msra.mxu1 %v464_v13  ;;  %v590_v13 = vld [vmem:[%s1057_s9 + $0xa8] sm:$0xff] }
  0x67   :  { %528 = vmatprep.subr.mxu1 %v463_v14  ;;  %v574_v14 = vld [vmem:[%s1057_s9 + $0x28] sm:$0xff] }
  0x68   :  { %529 = vmatpush2.msra.mxu1 %v462_v15  ;;  %v589_v15 = vld [vmem:[%s1057_s9 + $0xa0] sm:$0xff] }
  0x69   :  { %530 = vmatprep.subr.mxu1 %v461_v16  ;;  %v573_v16 = vld [vmem:[%s1057_s9 + $0x20] sm:$0xff] }
  0x6a   :  { %531 = vmatpush2.msra.mxu1 %v460_v17  ;;  %v588_v17 = vld [vmem:[%s1057_s9 + $0x98] sm:$0xff] }
  0x6b   :  { %532 = vmatprep.subr.mxu1 %v459_v18  ;;  %v572_v18 = vld [vmem:[%s1057_s9 + $0x18] sm:$0xff] }
  0x6c   :  { %533 = vmatpush2.msra.mxu1 %v458_v19  ;;  %v587_v19 = vld [vmem:[%s1057_s9 + $0x90] sm:$0xff] }
  0x6d   :  { %534 = vmatprep.subr.mxu1 %v457_v20  ;;  %v571_v20 = vld [vmem:[%s1057_s9 + $0x10] sm:$0xff] }
  0x6e   :  { %535 = vmatpush2.msra.mxu1 %v456_v21  ;;  %v586_v21 = vld [vmem:[%s1057_s9 + $0x88] sm:$0xff] }
  0x6f   :  { %536 = vmatprep.subr.mxu1 %v455_v22  ;;  %v570_v22 = vld [vmem:[%s1057_s9 + $0x8] sm:$0xff] }
  0x70   :  { %537 = vmatpush2.msra.mxu1 %v454_v23  ;;  %v585_v23 = vld [vmem:[%s1057_s9 + $0x80] sm:$0xff] }
  0x71   :  { %538 = vmatprep.subr.mxu1 %v453_v24  ;;  %v569_v24 = vld [vmem:[%s1057_s9] sm:$0xff] }
  0x72   :  { %539 = vmatpush2.msra.mxu1 %v452_v25  ;;  %v474_v25 = vld [vmem:[%s1056_s8] sm:$0x3] }
  0x73   :  { %540 = vmatprep.subr.mxu1 %v451_v26  ;;  %v479_v26 = vrot.slane %v474_v25, %v926_v33 }
  0x74   :  { %541 = vmatpush2.msra.mxu1 %v450_v27  ;;  %v483_v27 = vrot.slane %v474_v25, %v931_v36 }
  0x75   :  { %542 = vmatprep.subr.mxu1 %v449_v28 }
  0x76   :  { %543 = vmatpush2.msra.mxu1 %v448_v29 }
  0x77   :  { %544 = vmatprep.subr.mxu1 %v447_v30 }
  0x78   :  { %545 = vmatpush2.msra.mxu1 %v446_v31 }
  0x79   :  { %546 = vmatprep.subr.mxu1 %v445_v32 }
  0xdf   :  { %v145_v34 = vpop.f32.mrf.mxu1 }
  0xe1   :  { %v147_v37 = vpop.f32.mrf.mxu1 }
  0xe3   :  { %v220_v39 = vpop.f32.mrf.mxu1 }
  0xe4   :  { %v221_v40 = vadd.f32 %v220_v39, %v145_v34  ;;  %v444_v34 = vld [vmem:[#allocation5 + $0x110] sm:$0xff] }
  0xe5   :  { %v222_v42 = vpop.f32.mrf.mxu1  ;;  %547 = vmatpush2.msra.mxu1 %v444_v34 }
  0xe6   :  { %v237_v43 = vadd.f32 %v230_v38, %v221_v40  ;;  %v223_v44 = vadd.f32 %v222_v42, %v147_v37  ;;  %v442_v37 = vld [vmem:[#allocation5 + $0x100] sm:$0xff]  ;;  %548 = vmatprep.subr.mxu1 %v443_v35 }
  0xe7   :  { %549 = vmatpush2.msra.mxu1 %v442_v37  ;;  %v315_v38 = vld [vmem:[%s1054_s6] sm:$0x3] }
  0xe8   :  { %v239_v45 = vsub.f32 0.0, %v237_v43  ;;  %v238_v46 = vadd.f32 %v234_v41, %v223_v44  ;;  %v320_v39 = vrot.slane %v315_v38, %v926_v33  ;;  %v324_v40 = vrot.slane %v315_v38, %v931_v36 }
  0xea   :  { %v241_v47 = vmul.f32 1.442695, %v239_v45  ;;  %v240_v48 = vsub.f32 0.0, %v238_v46 }
  0xec   :  { %739 = vpow2.f32 %v241_v47  ;;  %v243_v49 = vmul.f32 1.442695, %v240_v48 }
  0xee   :  { %741 = vpow2.f32 %v243_v49 }
  0xf9   :  { %v740_v50 = vpop.eup %739 }
  0xfa   :  { %v245_v51 = vadd.f32 1.0, %v740_v50 }
  0xfb   :  { %v742_v52 = vpop.eup %741 }
  0xfc   :  { %v246_v53 = vadd.f32 1.0, %v742_v52  ;;  %743 = vrcp.f32 %v245_v51 }
  0xfe   :  { %745 = vrcp.f32 %v246_v53 }
 0x109   :  { %v744_v54 = vpop.eup %743 }
 0x10a   :  { %v248_v57 = vmul.f32 %v744_v54, %v237_v43 }
 0x10b   :  { %v746_v55 = vpop.eup %745 }
 0x10c   :  { %v250_v56 = vmul.f32 %v746_v55, %v238_v46 }
 0x10e   :  { %391 = vmatprep.mubr.f32.mxu0 %v250_v56 }
 0x10f   :  { %392 = vmatmul.mubr.f32.vlgmr.msra.gmra.mxu0 %v248_v57  ;;  %v600_v57 = vld [vmem:[%s1057_s9 + $0xf8] sm:$0xff] }
 0x110   :  { %698 = vmatprep.subr.mxu0 %v600_v57 }
 0x111   :  { %699 = vmatpush3.msra.mxu0 %v584_v58 }
 0x112   :  { %700 = vmatprep.subr.mxu0 %v599_v59 }
 0x113   :  { %701 = vmatpush3.msra.mxu0 %v583_v60 }
 0x114   :  { %702 = vmatprep.subr.mxu0 %v598_v61 }
 0x115   :  { %703 = vmatpush3.msra.mxu0 %v582_v62 }
 0x116   :  { %704 = vmatprep.subr.mxu0 %v597_v63 }
 0x117   :  { %705 = vmatpush3.msra.mxu0 %v581_v0 }
 0x118   :  { %706 = vmatprep.subr.mxu0 %v596_v1 }
 0x119   :  { %707 = vmatpush3.msra.mxu0 %v580_v2 }
 0x11a   :  { %708 = vmatprep.subr.mxu0 %v595_v3 }
 0x11b   :  { %709 = vmatpush3.msra.mxu0 %v579_v4 }
 0x11c   :  { %710 = vmatprep.subr.mxu0 %v594_v5 }
 0x11d   :  { %711 = vmatpush3.msra.mxu0 %v578_v6 }
 0x11e   :  { %712 = vmatprep.subr.mxu0 %v593_v7 }
 0x11f   :  { %713 = vmatpush3.msra.mxu0 %v577_v8 }
 0x120   :  { %714 = vmatprep.subr.mxu0 %v592_v9 }
 0x121   :  { %715 = vmatpush3.msra.mxu0 %v576_v10 }
 0x122   :  { %716 = vmatprep.subr.mxu0 %v591_v11 }
 0x123   :  { %717 = vmatpush3.msra.mxu0 %v575_v12 }
 0x124   :  { %718 = vmatprep.subr.mxu0 %v590_v13 }
 0x125   :  { %719 = vmatpush3.msra.mxu0 %v574_v14 }
 0x126   :  { %720 = vmatprep.subr.mxu0 %v589_v15 }
 0x127   :  { %721 = vmatpush3.msra.mxu0 %v573_v16 }
 0x128   :  { %722 = vmatprep.subr.mxu0 %v588_v17 }
 0x129   :  { %723 = vmatpush3.msra.mxu0 %v572_v18 }
 0x12a   :  { %724 = vmatprep.subr.mxu0 %v587_v19 }
 0x12b   :  { %725 = vmatpush3.msra.mxu0 %v571_v20 }
 0x12c   :  { %726 = vmatprep.subr.mxu0 %v586_v21 }
 0x12d   :  { %727 = vmatpush3.msra.mxu0 %v570_v22 }
 0x12e   :  { %728 = vmatprep.subr.mxu0 %v585_v23 }
 0x12f   :  { %729 = vmatpush3.msra.mxu0 %v569_v24 }
 0x1cf   :  { %v393_v41 = vpop.f32.mrf.mxu0 }
 0x1d0   :  { %v394_v42 = vadd.f32 %v393_v41, %v320_v39 }
 0x1d1   :  { %v395_v43 = vpop.f32.mrf.mxu0 }
 0x1d2   :  { %v398_v44 = vsub.f32 0.0, %v394_v42  ;;  %v396_v45 = vadd.f32 %v395_v43, %v324_v40 }
 0x1d4   :  { %v400_v46 = vmul.f32 1.442695, %v398_v44  ;;  %v399_v47 = vsub.f32 0.0, %v396_v45 }
 0x1d6   :  { %747 = vpow2.f32 %v400_v46  ;;  %v402_v48 = vmul.f32 1.442695, %v399_v47 }
 0x1d8   :  { %749 = vpow2.f32 %v402_v48 }
 0x1e3   :  { %v748_v49 = vpop.eup %747 }
 0x1e4   :  { %v404_v50 = vadd.f32 1.0, %v748_v49 }
 0x1e5   :  { %v750_v51 = vpop.eup %749 }
 0x1e6   :  { %v405_v52 = vadd.f32 1.0, %v750_v51  ;;  %751 = vrcp.f32 %v404_v50 }
 0x1e8   :  { %753 = vrcp.f32 %v405_v52 }
 0x1f3   :  { %v752_v53 = vpop.eup %751 }
 0x1f4   :  { %v407_v56 = vmul.f32 %v752_v53, %v394_v42 }
 0x1f5   :  { %v754_v54 = vpop.eup %753 }
 0x1f6   :  { %v409_v55 = vmul.f32 %v754_v54, %v396_v45  ;;  %v697_v45 = vld [vmem:[%s1058_s10] ss:$0 sm:$0xff] }
 0x1f8   :  { %550 = vmatprep.mubr.f32.mxu1 %v409_v55 }
 0x1f9   :  { %551 = vmatmul.mubr.f32.vlgmr.msra.gmra.mxu1 %v407_v56 }
 0x2b9   :  { %v552_v28 = vpop.f32.mrf.mxu1 }
 0x2ba   :  { %v553_v29 = vadd.f32 %v552_v28, %v479_v26 }
 0x2bb   :  { %v554_v30 = vpop.f32.mrf.mxu1 }
 0x2bc   :  { %v557_v31 = vsub.f32 0.0, %v553_v29  ;;  %v555_v32 = vadd.f32 %v554_v30, %v483_v27 }
 0x2be   :  { %v559_v34 = vmul.f32 1.442695, %v557_v31  ;;  %v558_v35 = vsub.f32 0.0, %v555_v32 }
 0x2c0   :  { %755 = vpow2.f32 %v559_v34  ;;  %v561_v37 = vmul.f32 1.442695, %v558_v35 }
 0x2c2   :  { %757 = vpow2.f32 %v561_v37 }
 0x2cd   :  { %v756_v38 = vpop.eup %755 }
 0x2ce   :  { %v563_v39 = vadd.f32 1.0, %v756_v38 }
 0x2cf   :  { %v758_v40 = vpop.eup %757 }
 0x2d0   :  { %v564_v41 = vadd.f32 1.0, %v758_v40  ;;  %759 = vrcp.f32 %v563_v39 }
 0x2d2   :  { %761 = vrcp.f32 %v564_v41 }
 0x2dd   :  { %v760_v42 = vpop.eup %759 }
 0x2de   :  { %v566_v36 = vmul.f32 %v760_v42, %v553_v29 }
 0x2df   :  { %v762_v33 = vpop.eup %761 }
 0x2e0   :  { %v568_v43 = vmul.f32 %v762_v33, %v555_v32 }
 0x2e2   :  { %672 = vmatprep.mubr.f32.mxu0 %v568_v43 }
 0x2e3   :  { %673 = vmatmul.mubr.f32.vlgmr.msra.gmra.mxu0 %v566_v36 }
 0x3a3   :  { %v730_v44 = vpop.f32.mrf.mxu0 }
 0x3a5   :  { %v731_v46 = vpop.f32.mrf.mxu0 }
 0x3a6   :  { %v732_v47 = vadd.f32 %v731_v46, %v730_v44 }
 0x3a8   :  { %v675_v48 = vadd.f32 %v732_v47, %v697_v45 }
 0x3aa   :  { %678 = vst.msk [vmem:[#allocation7] sm:$0xff] %vm150_vm1, %v675_v48 }
 0x3ab   :  { %814 = shalt.err (!%p811_p0)
}
 0x3ac   :  { %688 = dma.vmem_to_hbm [thread:$0]  %s686_s7, 128, %s1059_s11, [#allocation4]  }
 0x3ad   :  { %827 = dma.done.wait [#allocation4], 128  }
 0x3ae   :  { %828 = vsyncadd [#allocation4], 4294967168 }
 0x3af   :  { %692 = vsyncpa [#allocation3], 1 }
 0x3b0   :  { %693 = vsyncpa [#allocation6], 1 }
 0x3b1   :  { %694 = vsyncpa [#allocation4], 1 }

</bundles_post_ra>
